<compile_context>
chip_gen: v5e
topology: v5e:2x2
jax: 0.10.0
libtpu: 0.0.40
codegen_flags: <defaults>
</compile_context>

<pallas_src>
import jax
import jax.numpy as jnp
from jax import lax
from jax.experimental import pallas as pl
from jax.experimental.pallas import tpu as pltpu


# Set True on v7x at production channel counts (C >= ~512): these blocks never change
# index, so default double-buffering only doubles their VMEM residency.  Irrelevant at
# demo size, so the default lowering path is kept maximally simple.
_SINGLE_BUFFER_WEIGHTS = False


def _eye(n, dtype):
    # explicit 2-D iota identity (TPU requires >= 2-D iota)
    r = lax.broadcasted_iota(jnp.int32, (n, n), 0)
    c = lax.broadcasted_iota(jnp.int32, (n, n), 1)
    return (r == c).astype(dtype)


# ---------------------------------------------------------------------------
# Pallas kernel: Bt batch elements per grid step, fully fused block, NCW in/out.
# ---------------------------------------------------------------------------
def residual_block_kernel(
    x_ref,      # (Bt, C, L)  f32 input, PyTorch NCW layout
    w1_ref,     # (3C, C)     bf16 conv1 weights (taps stacked along K, BN1 scale folded)
    bn1b_ref,   # (1, C)      f32 BN1 folded bias
    w2_ref,     # (3C, C)     bf16 conv2 weights (BN2 scale folded)
    bn2b_ref,   # (1, C)      f32 BN2 folded bias
    wfc1_ref,   # (C, H)      f32 SE fc1 (transposed for x @ W)
    wfc2_ref,   # (H, C)      f32 SE fc2
    o_ref,      # (Bt, C, L)  f32 output, NCW layout
):
    x_ncl = x_ref[...]                                   # (Bt, C, L) f32
    Bt, C, L = x_ncl.shape

    # --- NCW -> NLC transpose in VMEM via identity matmul (runs on the MXU) ------
    # einsum('blj,bcj->blc'): batch dim leading, both operands contract on their
    # minor dim, output in natural dot_general order -> single supported dot.
    eye_l = jnp.broadcast_to(_eye(L, jnp.bfloat16), (Bt, L, L))
    x_nlc = jnp.einsum("blj,bcj->blc", eye_l, x_ncl.astype(jnp.bfloat16),
                       preferred_element_type=jnp.float32)       # (Bt, L, C), exact
    x_nlc_bf = x_nlc.astype(jnp.bfloat16)

    def taps(v_bf):
        # (Bt, L, C) bf16 -> (Bt*L, 3C) bf16 rows [v[l-1] | v[l] | v[l+1]],
        # zero padded at the per-element sequence boundaries (static slices only).
        z = jnp.zeros((Bt, 1, C), v_bf.dtype)
        p = jnp.concatenate([z, v_bf, z], axis=1)                # (Bt, L+2, C)
        cat = jnp.concatenate([p[:, :L, :], v_bf, p[:, 2:, :]], axis=2)
        return cat.reshape(Bt * L, 3 * C)

    def conv3(v_bf, w_ref):
        # k=3, pad=1, stride=1 conv as ONE (Bt*L, 3C) @ (3C, C) MXU matmul.
        return jnp.dot(taps(v_bf), w_ref[...],
                       preferred_element_type=jnp.float32)       # (Bt*L, C) f32

    # conv1 (BN1 scale pre-folded into weights) -> +bias -> relu
    h = jnp.maximum(conv3(x_nlc_bf, w1_ref) + bn1b_ref[...], 0.0)

    # conv2 (BN2 scale pre-folded) -> +bias
    out = conv3(h.astype(jnp.bfloat16).reshape(Bt, L, C), w2_ref) + bn2b_ref[...]
    out3 = out.reshape(Bt, L, C)                                 # f32 "original_out"

    # SE: global average pool over L -> fc1 -> relu -> fc2 -> sigmoid (batched)
    s = jnp.mean(out3, axis=1)                                   # (Bt, C)
    e = jnp.maximum(jnp.dot(s, wfc1_ref[...],
                            preferred_element_type=jnp.float32), 0.0)   # (Bt, H)
    se = jax.nn.sigmoid(jnp.dot(e, wfc2_ref[...],
                                preferred_element_type=jnp.float32))    # (Bt, C)

    gated_nlc = out3 * se[:, None, :]                            # (Bt, L, C) f32

    # --- NLC -> NCW transpose (same identity-matmul trick, f32 -> exact) --------
    eye_c = jnp.broadcast_to(_eye(C, jnp.float32), (Bt, C, C))
    gated_ncl = jnp.einsum("bcj,blj->bcl", eye_c, gated_nlc,
                           preferred_element_type=jnp.float32)   # (Bt, C, L)

    # residual add with the original NCW block (identity = x), final relu, store NCW
    o_ref[...] = jnp.maximum(gated_ncl + x_ncl, 0.0).astype(o_ref.dtype)


# ---------------------------------------------------------------------------
# Wrapper: PyTorch NCW in/out, parameter folding, pallas_call plumbing.
# ---------------------------------------------------------------------------
def _const_spec(shape):
    """BlockSpec for a grid-invariant (constant-index) operand."""
    zeros = (0,) * len(shape)
    if _SINGLE_BUFFER_WEIGHTS:
        return pl.BlockSpec(shape, lambda i: zeros, pipeline_mode=pl.Buffered(1))
    return pl.BlockSpec(shape, lambda i: zeros)


def _plan_batch(B, L, target_rows=512, min_steps=2):
    """Pick (batch_tile Bt, padded_batch Bp).

    - Bt * L ~= target_rows so each grid step feeds the MXU 512+ rows and the
      ~0.35us/step pipeline overhead is amortised.
    - keep >= min_steps grid steps when B allows (feeds both v7x TensorCores).
    - if B has no suitable divisor, pad the batch instead of degrading to Bt=1.
    """
    cap = max(1, target_rows // max(L, 1))
    if B >= min_steps:
        cap = min(cap, -(-B // min_steps))          # ceil(B / min_steps)
    cap = max(1, min(cap, B))
    best_div = max((d for d in range(1, cap + 1) if B % d == 0), default=1)
    bt = best_div if best_div * 2 >= cap else cap   # pad only when divisors are poor
    bp = -(-B // bt) * bt
    return bt, bp


@jax.jit
def residual_block_pallas(x_ncl, w1, bn1, w2, bn2, fc1_w, fc2_w):
    B, C, L = x_ncl.shape
    eps = 1e-5

    # eval-mode BN -> per-channel scale/bias; scale gets folded into conv weights.
    def fold_bn(gamma, beta, mean, var):
        scale = gamma / jnp.sqrt(var + eps)
        return scale, beta - mean * scale

    s1, b1 = fold_bn(*bn1)
    s2, b2 = fold_bn(*bn2)

    # conv weights: torch (C_out, C_in, 3) -> (3*C_in, C_out), taps stacked along K
    # so each conv is ONE matmul; BN scale folded per output channel IN F32, then
    # cast to bf16 (MXU-native, halves weight DMA/VMEM residency).
    def prep_w(w, scale):
        wf = jnp.transpose(w, (2, 1, 0)).reshape(3 * C, C)
        return (wf * scale[None, :]).astype(jnp.bfloat16)

    w1_f, w2_f = prep_w(w1, s1), prep_w(w2, s2)
    bn1b, bn2b = b1.reshape(1, C), b2.reshape(1, C)

    wfc1 = fc1_w.T.astype(jnp.float32)      # (C, H)
    wfc2 = fc2_w.T.astype(jnp.float32)      # (H, C)
    H = wfc1.shape[1]

    Bt, Bp = _plan_batch(B, L)
    x_in = x_ncl.astype(jnp.float32)        # NCW goes straight in -- no HBM transpose
    if Bp != B:
        x_in = jnp.pad(x_in, ((0, Bp - B), (0, 0), (0, 0)))

    # VMEM budget: 2 activation blocks x 2 pipeline buffers + (double-buffered)
    # weights, with generous headroom; clipped to stay within v7x's 64 MiB VMEM.
    blk = Bt * C * L * 4
    wts = 2 * (3 * C * C * 2) + 2 * (4 * C) + 2 * (C * H * 4)
    vmem_limit = int(min(48 * 1024 * 1024,
                         max(16 * 1024 * 1024, 8 * (4 * blk + 2 * wts))))

    out = pl.pallas_call(
        residual_block_kernel,
        out_shape=jax.ShapeDtypeStruct((Bp, C, L), jnp.float32),
        grid_spec=pltpu.PrefetchScalarGridSpec(
            num_scalar_prefetch=0,
            grid=(Bp // Bt,),
            in_specs=[
                pl.BlockSpec((Bt, C, L), lambda i: (i, 0, 0)),   # x, NCW blocks
                _const_spec((3 * C, C)),                         # w1 (bf16, BN1 scale folded)
                _const_spec((1, C)),                             # bn1 bias
                _const_spec((3 * C, C)),                         # w2 (bf16, BN2 scale folded)
                _const_spec((1, C)),                             # bn2 bias
                _const_spec((C, H)),                             # SE fc1
                _const_spec((H, C)),                             # SE fc2
            ],
            out_specs=pl.BlockSpec((Bt, C, L), lambda i: (i, 0, 0)),
        ),
        compiler_params=pltpu.CompilerParams(
            dimension_semantics=("parallel",),   # batch axis -> shards over v7x's 2 TCs
            vmem_limit_bytes=vmem_limit,
        ),
    )(x_in, w1_f, bn1b, w2_f, bn2b, wfc1, wfc2)

    return out[:B]


# ---------------------------------------------------------------------------
# Pure-JAX f32 reference (mirrors the PyTorch forward, eval-mode BN)
# ---------------------------------------------------------------------------
def residual_block_reference(x, w1, bn1, w2, bn2, fc1_w, fc2_w):
    eps = 1e-5

    def conv1d(inp, w):
        return lax.conv_general_dilated(
            inp, w, window_strides=(1,), padding=((1, 1),),
            dimension_numbers=("NCH", "OIH", "NCH"))

    def bn(inp, gamma, beta, mean, var):
        return ((inp - mean[None, :, None])
                / jnp.sqrt(var[None, :, None] + eps)
                * gamma[None, :, None] + beta[None, :, None])

    out = jax.nn.relu(bn(conv1d(x, w1), *bn1))
    out = bn(conv1d(out, w2), *bn2)
    orig = out
    s = jnp.mean(out, axis=2)                          # (B, C)
    h = jax.nn.relu(s @ fc1_w.T)
    se = jax.nn.sigmoid(h @ fc2_w.T)[:, :, None]
    out = orig * se + x
    return jax.nn.relu(out)


if __name__ == "__main__":
    # small shapes consistent with the module: out_channel // 16 must be >= 1
    B, C, L = 8, 32, 16
    H = C // 16

    key = jax.random.PRNGKey(0)
    ks = jax.random.split(key, 12)

    x = jax.random.normal(ks[0], (B, C, L), dtype=jnp.float32)

    w1 = 0.1 * jax.random.normal(ks[1], (C, C, 3), dtype=jnp.float32)
    w2 = 0.1 * jax.random.normal(ks[2], (C, C, 3), dtype=jnp.float32)

    bn1 = (1.0 + 0.1 * jax.random.normal(ks[3], (C,), dtype=jnp.float32),     # gamma
           0.1 * jax.random.normal(ks[4], (C,), dtype=jnp.float32),           # beta
           0.1 * jax.random.normal(ks[5], (C,), dtype=jnp.float32),           # running_mean
           0.5 + jnp.abs(jax.random.normal(ks[6], (C,), dtype=jnp.float32)))  # running_var
    bn2 = (1.0 + 0.1 * jax.random.normal(ks[7], (C,), dtype=jnp.float32),
           0.1 * jax.random.normal(ks[8], (C,), dtype=jnp.float32),
           0.1 * jax.random.normal(ks[9], (C,), dtype=jnp.float32),
           0.5 + jnp.abs(jax.random.normal(ks[10], (C,), dtype=jnp.float32)))

    kfc = jax.random.split(ks[11], 2)
    fc1_w = 0.2 * jax.random.normal(kfc[0], (H, C), dtype=jnp.float32)  # torch Linear(C, H)
    fc2_w = 0.2 * jax.random.normal(kfc[1], (C, H), dtype=jnp.float32)  # torch Linear(H, C)

    out = residual_block_pallas(x, w1, bn1, w2, bn2, fc1_w, fc2_w)
    out = jax.block_until_ready(out)

    ref = residual_block_reference(x, w1, bn1, w2, bn2, fc1_w, fc2_w)
    assert out.shape == (B, C, L)
    # bf16 conv operands/weights -> loosened tolerance vs the f32 reference.
    assert jnp.allclose(out, ref, rtol=5e-2, atol=5e-2), (
        float(jnp.max(jnp.abs(out - ref))))

    print("KERNEL_OK")
</pallas_src>

<mosaic_0001>
module attributes {stable_mosaic.version = 11 : i64} {
  func.func @residual_block_kernel(%arg0: i32, %arg1: memref<4x32x16xf32, #tpu.memory_space<vmem>>, %arg2: memref<96x32xbf16, #tpu.memory_space<vmem>>, %arg3: memref<1x32xf32, #tpu.memory_space<vmem>>, %arg4: memref<96x32xbf16, #tpu.memory_space<vmem>>, %arg5: memref<1x32xf32, #tpu.memory_space<vmem>>, %arg6: memref<32x2xf32, #tpu.memory_space<vmem>>, %arg7: memref<2x32xf32, #tpu.memory_space<vmem>>, %arg8: memref<4x32x16xf32, #tpu.memory_space<vmem>>) attributes {dimension_semantics = [#tpu.dimension_semantics<parallel>], iteration_bounds = array<i64: 2>, scalar_prefetch = 0 : i64, scratch_operands = 0 : i64, tpu.core_type = #tpu.core_type<tc>, window_params = [{transform_indices = @transform_0, window_bounds = array<i64: 4, 32, 16>}, {pipeline_mode = #tpu.pipeline_mode<synchronous>, transform_indices = @transform_1, window_bounds = array<i64: 96, 32>}, {pipeline_mode = #tpu.pipeline_mode<synchronous>, transform_indices = @transform_2, window_bounds = array<i64: 1, 32>}, {pipeline_mode = #tpu.pipeline_mode<synchronous>, transform_indices = @transform_3, window_bounds = array<i64: 96, 32>}, {pipeline_mode = #tpu.pipeline_mode<synchronous>, transform_indices = @transform_4, window_bounds = array<i64: 1, 32>}, {pipeline_mode = #tpu.pipeline_mode<synchronous>, transform_indices = @transform_5, window_bounds = array<i64: 32, 2>}, {pipeline_mode = #tpu.pipeline_mode<synchronous>, transform_indices = @transform_6, window_bounds = array<i64: 2, 32>}, {transform_indices = @transform_7, window_bounds = array<i64: 4, 32, 16>}]} {
    %c0 = arith.constant 0 : index
    %c0_0 = arith.constant 0 : index
    %c0_1 = arith.constant 0 : index
    %0 = vector.load %arg1[%c0, %c0_0, %c0_1] : memref<4x32x16xf32, #tpu.memory_space<vmem>>, vector<4x32x16xf32>
    %1 = tpu.iota {dimensions = array<i32: 0>} : vector<16x16xi32>
    %2 = tpu.iota {dimensions = array<i32: 1>} : vector<16x16xi32>
    %3 = arith.cmpi eq, %1, %2 : vector<16x16xi32>
    %4 = arith.extui %3 : vector<16x16xi1> to vector<16x16xi32>
    %5 = arith.sitofp %4 : vector<16x16xi32> to vector<16x16xf32>
    %6 = arith.truncf %5 : vector<16x16xf32> to vector<16x16xbf16>
    %7 = vector.shape_cast %6 : vector<16x16xbf16> to vector<1x16x16xbf16>
    %8 = vector.broadcast %7 : vector<1x16x16xbf16> to vector<4x16x16xbf16>
    %9 = arith.truncf %0 : vector<4x32x16xf32> to vector<4x32x16xbf16>
    "tpu.trace_start"() <{level = 10 : i32, message = "blj,bcj->blc"}> : () -> ()
    %cst = arith.constant dense<0.000000e+00> : vector<4x16x32xf32>
    %10 = tpu.matmul %8, %9, %cst {dimension_numbers = #tpu.dot_dimension_numbers<[2], [2], [1], [1], [0, 0, 0, 1, 1, 1], [0], [0]>} : vector<4x16x16xbf16>, vector<4x32x16xbf16>, vector<4x16x32xf32> -> vector<4x16x32xf32>
    "tpu.trace_stop"() : () -> ()
    %11 = arith.truncf %10 : vector<4x16x32xf32> to vector<4x16x32xbf16>
    %cst_2 = arith.constant 0.000000e+00 : bf16
    %12 = vector.broadcast %cst_2 : bf16 to vector<4x1x32xbf16>
    %13 = tpu.concatenate %12, %11, %12 in 1 : vector<4x1x32xbf16>, vector<4x16x32xbf16>, vector<4x1x32xbf16> -> vector<4x18x32xbf16>
    %14 = vector.extract_strided_slice %13 {offsets = [0, 0, 0], sizes = [4, 16, 32], strides = [1, 1, 1]} : vector<4x18x32xbf16> to vector<4x16x32xbf16>
    %15 = vector.extract_strided_slice %13 {offsets = [0, 2, 0], sizes = [4, 16, 32], strides = [1, 1, 1]} : vector<4x18x32xbf16> to vector<4x16x32xbf16>
    %16 = tpu.concatenate %14, %11, %15 in 2 : vector<4x16x32xbf16>, vector<4x16x32xbf16>, vector<4x16x32xbf16> -> vector<4x16x96xbf16>
    %17 = vector.shape_cast %16 : vector<4x16x96xbf16> to vector<64x96xbf16>
    %c0_3 = arith.constant 0 : index
    %c0_4 = arith.constant 0 : index
    %18 = vector.load %arg2[%c0_3, %c0_4] : memref<96x32xbf16, #tpu.memory_space<vmem>>, vector<96x32xbf16>
    %cst_5 = arith.constant dense<0.000000e+00> : vector<64x32xf32>
    %19 = tpu.matmul %17, %18, %cst_5 {dimension_numbers = #tpu.dot_dimension_numbers<[1], [0], [0], [1], [0, 0, 1, 1], [], []>} : vector<64x96xbf16>, vector<96x32xbf16>, vector<64x32xf32> -> vector<64x32xf32>
    %c0_6 = arith.constant 0 : index
    %c0_7 = arith.constant 0 : index
    %20 = vector.load %arg3[%c0_6, %c0_7] : memref<1x32xf32, #tpu.memory_space<vmem>>, vector<1x32xf32>
    %21 = vector.broadcast %20 : vector<1x32xf32> to vector<64x32xf32>
    %22 = arith.addf %19, %21 : vector<64x32xf32>
    %cst_8 = arith.constant 0.000000e+00 : f32
    %23 = vector.broadcast %cst_8 : f32 to vector<64x32xf32>
    %24 = arith.maximumf %22, %23 : vector<64x32xf32>
    %25 = arith.truncf %24 : vector<64x32xf32> to vector<64x32xbf16>
    %26 = vector.shape_cast %25 : vector<64x32xbf16> to vector<4x16x32xbf16>
    %cst_9 = arith.constant 0.000000e+00 : bf16
    %27 = vector.broadcast %cst_9 : bf16 to vector<4x1x32xbf16>
    %28 = tpu.concatenate %27, %26, %27 in 1 : vector<4x1x32xbf16>, vector<4x16x32xbf16>, vector<4x1x32xbf16> -> vector<4x18x32xbf16>
    %29 = vector.extract_strided_slice %28 {offsets = [0, 0, 0], sizes = [4, 16, 32], strides = [1, 1, 1]} : vector<4x18x32xbf16> to vector<4x16x32xbf16>
    %30 = vector.extract_strided_slice %28 {offsets = [0, 2, 0], sizes = [4, 16, 32], strides = [1, 1, 1]} : vector<4x18x32xbf16> to vector<4x16x32xbf16>
    %31 = tpu.concatenate %29, %26, %30 in 2 : vector<4x16x32xbf16>, vector<4x16x32xbf16>, vector<4x16x32xbf16> -> vector<4x16x96xbf16>
    %32 = vector.shape_cast %31 : vector<4x16x96xbf16> to vector<64x96xbf16>
    %c0_10 = arith.constant 0 : index
    %c0_11 = arith.constant 0 : index
    %33 = vector.load %arg4[%c0_10, %c0_11] : memref<96x32xbf16, #tpu.memory_space<vmem>>, vector<96x32xbf16>
    %cst_12 = arith.constant dense<0.000000e+00> : vector<64x32xf32>
    %34 = tpu.matmul %32, %33, %cst_12 {dimension_numbers = #tpu.dot_dimension_numbers<[1], [0], [0], [1], [0, 0, 1, 1], [], []>} : vector<64x96xbf16>, vector<96x32xbf16>, vector<64x32xf32> -> vector<64x32xf32>
    %c0_13 = arith.constant 0 : index
    %c0_14 = arith.constant 0 : index
    %35 = vector.load %arg5[%c0_13, %c0_14] : memref<1x32xf32, #tpu.memory_space<vmem>>, vector<1x32xf32>
    %36 = vector.broadcast %35 : vector<1x32xf32> to vector<64x32xf32>
    %37 = arith.addf %34, %36 : vector<64x32xf32>
    %38 = vector.shape_cast %37 : vector<64x32xf32> to vector<4x16x32xf32>
    %cst_15 = arith.constant dense<0.000000e+00> : vector<4x32xf32>
    %39 = vector.multi_reduction <add>, %38, %cst_15 [1] : vector<4x16x32xf32> to vector<4x32xf32>
    %cst_16 = arith.constant 1.600000e+01 : f32
    %40 = vector.broadcast %cst_16 : f32 to vector<4x32xf32>
    %41 = arith.divf %39, %40 : vector<4x32xf32>
    %c0_17 = arith.constant 0 : index
    %c0_18 = arith.constant 0 : index
    %42 = vector.load %arg6[%c0_17, %c0_18] : memref<32x2xf32, #tpu.memory_space<vmem>>, vector<32x2xf32>
    %cst_19 = arith.constant dense<0.000000e+00> : vector<4x2xf32>
    %43 = tpu.matmul %41, %42, %cst_19 {dimension_numbers = #tpu.dot_dimension_numbers<[1], [0], [0], [1], [0, 0, 1, 1], [], []>} : vector<4x32xf32>, vector<32x2xf32>, vector<4x2xf32> -> vector<4x2xf32>
    %cst_20 = arith.constant 0.000000e+00 : f32
    %44 = vector.broadcast %cst_20 : f32 to vector<4x2xf32>
    %45 = arith.maximumf %43, %44 : vector<4x2xf32>
    %c0_21 = arith.constant 0 : index
    %c0_22 = arith.constant 0 : index
    %46 = vector.load %arg7[%c0_21, %c0_22] : memref<2x32xf32, #tpu.memory_space<vmem>>, vector<2x32xf32>
    %cst_23 = arith.constant dense<0.000000e+00> : vector<4x32xf32>
    %47 = tpu.matmul %45, %46, %cst_23 {dimension_numbers = #tpu.dot_dimension_numbers<[1], [0], [0], [1], [0, 0, 1, 1], [], []>} : vector<4x2xf32>, vector<2x32xf32>, vector<4x32xf32> -> vector<4x32xf32>
    %48 = arith.negf %47 : vector<4x32xf32>
    %49 = math.exp %48 : vector<4x32xf32>
    %cst_24 = arith.constant 1.000000e+00 : f32
    %50 = vector.broadcast %cst_24 : f32 to vector<4x32xf32>
    %51 = arith.addf %50, %49 : vector<4x32xf32>
    %52 = arith.divf %50, %51 : vector<4x32xf32>
    %53 = vector.shape_cast %52 : vector<4x32xf32> to vector<4x1x32xf32>
    %54 = vector.broadcast %53 : vector<4x1x32xf32> to vector<4x16x32xf32>
    %55 = arith.mulf %38, %54 : vector<4x16x32xf32>
    %56 = tpu.iota {dimensions = array<i32: 0>} : vector<32x32xi32>
    %57 = tpu.iota {dimensions = array<i32: 1>} : vector<32x32xi32>
    %58 = arith.cmpi eq, %56, %57 : vector<32x32xi32>
    %59 = arith.extui %58 : vector<32x32xi1> to vector<32x32xi32>
    %60 = arith.sitofp %59 : vector<32x32xi32> to vector<32x32xf32>
    %61 = vector.shape_cast %60 : vector<32x32xf32> to vector<1x32x32xf32>
    %62 = vector.broadcast %61 : vector<1x32x32xf32> to vector<4x32x32xf32>
    "tpu.trace_start"() <{level = 10 : i32, message = "bcj,blj->bcl"}> : () -> ()
    %cst_25 = arith.constant dense<0.000000e+00> : vector<4x32x16xf32>
    %63 = tpu.matmul %62, %55, %cst_25 {dimension_numbers = #tpu.dot_dimension_numbers<[2], [2], [1], [1], [0, 0, 0, 1, 1, 1], [0], [0]>} : vector<4x32x32xf32>, vector<4x16x32xf32>, vector<4x32x16xf32> -> vector<4x32x16xf32>
    "tpu.trace_stop"() : () -> ()
    %64 = arith.addf %63, %0 : vector<4x32x16xf32>
    %cst_26 = arith.constant 0.000000e+00 : f32
    %65 = vector.broadcast %cst_26 : f32 to vector<4x32x16xf32>
    %66 = arith.maximumf %64, %65 : vector<4x32x16xf32>
    %c0_27 = arith.constant 0 : index
    %c0_28 = arith.constant 0 : index
    %c0_29 = arith.constant 0 : index
    %67 = vector.load %arg8[%c0_27, %c0_28, %c0_29] : memref<4x32x16xf32, #tpu.memory_space<vmem>>, vector<4x32x16xf32>
    tpu.vector_store %arg8[%c0_27, %c0_28, %c0_29], %66 {strides = array<i32>} : memref<4x32x16xf32, #tpu.memory_space<vmem>>, vector<4x32x16xf32>,
    return
  }
  func.func @transform_0(%arg0: i32) -> (i32, i32, i32) {
    %c0_i32 = arith.constant 0 : i32
    %c0_i32_0 = arith.constant 0 : i32
    %c0_i32_1 = arith.constant 0 : i32
    return %arg0, %c0_i32, %c0_i32_0 : i32, i32, i32
  }
  func.func @transform_1(%arg0: i32) -> (i32, i32) {
    %c0_i32 = arith.constant 0 : i32
    %c0_i32_0 = arith.constant 0 : i32
    %c0_i32_1 = arith.constant 0 : i32
    return %c0_i32, %c0_i32_0 : i32, i32
  }
  func.func @transform_2(%arg0: i32) -> (i32, i32) {
    %c0_i32 = arith.constant 0 : i32
    %c0_i32_0 = arith.constant 0 : i32
    %c0_i32_1 = arith.constant 0 : i32
    return %c0_i32, %c0_i32_0 : i32, i32
  }
  func.func @transform_3(%arg0: i32) -> (i32, i32) {
    %c0_i32 = arith.constant 0 : i32
    %c0_i32_0 = arith.constant 0 : i32
    %c0_i32_1 = arith.constant 0 : i32
    return %c0_i32, %c0_i32_0 : i32, i32
  }
  func.func @transform_4(%arg0: i32) -> (i32, i32) {
    %c0_i32 = arith.constant 0 : i32
    %c0_i32_0 = arith.constant 0 : i32
    %c0_i32_1 = arith.constant 0 : i32
    return %c0_i32, %c0_i32_0 : i32, i32
  }
  func.func @transform_5(%arg0: i32) -> (i32, i32) {
    %c0_i32 = arith.constant 0 : i32
    %c0_i32_0 = arith.constant 0 : i32
    %c0_i32_1 = arith.constant 0 : i32
    return %c0_i32, %c0_i32_0 : i32, i32
  }
  func.func @transform_6(%arg0: i32) -> (i32, i32) {
    %c0_i32 = arith.constant 0 : i32
    %c0_i32_0 = arith.constant 0 : i32
    %c0_i32_1 = arith.constant 0 : i32
    return %c0_i32, %c0_i32_0 : i32, i32
  }
  func.func @transform_7(%arg0: i32) -> (i32, i32, i32) {
    %c0_i32 = arith.constant 0 : i32
    %c0_i32_0 = arith.constant 0 : i32
    %c0_i32_1 = arith.constant 0 : i32
    return %arg0, %c0_i32, %c0_i32_0 : i32, i32, i32
  }
}

</mosaic_0001>

<bundles_post_ra>
// kernel: residual_block_pallas.1
= control target key start
LH: loop header
LB: loop body
LE: loop exit
PB: predicated region body
PF: predicated region fallthrough
CT: control target
= control target key end

     0   :  { %s1507_s24 = smov 0   ;;  %s1921_s0 = inlined_call_operand.vmem [shape: f32[8,32,16], index: 0, kind: input, shape index: {}]   ;;  %s1922_s1 = inlined_call_operand.vmem [shape: bf16[96,32], index: 1, kind: input, shape index: {}]   ;;  %s1923_s2 = inlined_call_operand.vmem [shape: f32[1,32], index: 2, kind: input, shape index: {}]   ;;  %s1924_s3 = inlined_call_operand.vmem [shape: bf16[96,32], index: 3, kind: input, shape index: {}]   ;;  %s1925_s4 = inlined_call_operand.vmem [shape: f32[1,32], index: 4, kind: input, shape index: {}]   ;;  %s1926_s5 = inlined_call_operand.vmem [shape: f32[32,2], index: 5, kind: input, shape index: {}]   ;;  %s1927_s6 = inlined_call_operand.vmem [shape: f32[2,32], index: 6, kind: input, shape index: {}]   ;;  %s1928_s7 = inlined_call_operand.vmem [shape: f32[8,32,16], index: 7, kind: output, shape index: {}]  }
   0x1 LB: > { %s1313_s25 = sadd.s32 4294967295, %s1461_s24   ;;  %p1317_p0 = scmp.ge.s32.totalorder %s1461_s24, 1  ;;  %s1461_s24 = sphi %s1507_s24, %s17_s24  }
   0x2   : > { %p239_p1 = scmp.lt.s32.totalorder %s1461_s24, 3 }
   0x4   : > { %p240_p2 = pnand %p1317_p0, %p239_p1 }
   0x5   : > { %s1318_s26 = sshll.u32 (!%p240_p2), %s1313_s25, 2  ;;  %s1464_s8 = smov (!%p240_p2), 32  }
   0x6   : > { %243 = sbr.rel (%p240_p2) target bundleno = 1277 (0x4fd), region = 48  ;;  %p274_p3 = scmp.lt.s32.totalorder (!%p240_p2), %s1318_s26, 7 }
   0x7   : > { %s1465_s9 = smov (!%p240_p2), 64  }
   0xb   : > { %v304_v0 = vlaneseq  ;;  %s1932_s26 = smov (!%p274_p3, %s1318_s26), 7  ;;  %vm348_vm2 = vcmask 130048   ;;  %v1463_v13 = vmov 0.0   ;;  %vm526_vm3 = vcmask 1040384  }
   0xc   : > { %s1418_s27 = sshll.u32 %s1932_s26, 5  ;;  %vm527_vm4 = vsmask.f32 256  ;;  %vm553_vm6 = vcmask 1046528   ;;  %vm574_vm7 = vcmask 261120   ;;  %vm648_vm8 = vcmask 785408  }
   0xd   : > { %v1515_v1 = vshrl.u32 %v304_v0, 7  ;;  %v1517_v2 = vand.u32 127, %v304_v0  ;;  %s1530_s30 = scalar_lea.vmem %s1921_s0, %s1418_s27  ;;  %vm1627_vm5 = vmand %vm526_vm3, %vm527_vm4  ;;  %vm587_vm9 = vcmask 523264   ;;  %vm1000_vm10 = vcmask 1041408   ;;  %s1869_s13 = scalar_lea.vmem %s1928_s7, %s1418_s27 }
   0xe   : > { %v1534_v4 = vld [vmem:[%s1530_s30 + $0x10] sm:$0xff]  ;;  %v1537_v5 = vld [vmem:[%s1530_s30 + $0x18] sm:$0xff]  ;;  %v1563_v20 = vld [vmem:[%s1530_s30] sm:$0xff]  ;;  %vm966_vm12 = vcmask 1041409   ;;  %vm968_vm13 = vcmask 1042434   ;;  %vm970_vm14 = vcmask 1043459  }
   0xf   : > { %v306_v3 = vadd.s32 8, %v1515_v1  ;;  %vm309_vm0 = vcmp.eq.s32.totalorder %v1515_v1, %v1517_v2  ;;  %v1540_v6 = vld [vmem:[%s1530_s30 + $0x30] sm:$0xff]  ;;  %v319_v7 = vpack.c.bf16 %v1534_v4, %v1534_v4  ;;  %v320_v8 = vpack.c.bf16 %v1537_v5, %v1537_v5  ;;  %v1547_v9 = vld [vmem:[%s1530_s30 + $0x38] sm:$0xff]  ;;  %v1573_v26 = vld [vmem:[%s1530_s30 + $0x8] sm:$0xff] }
  0x10   : > { %v323_v10 = vpack.c.bf16 %v1540_v6, %v1540_v6  ;;  %v298_v11 = vld [vmem:[%s1530_s30 + $0x50] sm:$0xff]  ;;  %v299_v12 = vld [vmem:[%s1530_s30 + $0x58] sm:$0xff]  ;;  %v1554_v14 = vsel %vm309_vm0, 1.0, %v1463_v13  ;;  %v324_v15 = vpack.c.bf16 %v1547_v9, %v1547_v9  ;;  %v1576_v27 = vld [vmem:[%s1530_s30 + $0x20] sm:$0xff]  ;;  %v317_v35 = vpack.c.bf16 %v1563_v20, %v1563_v20 }
  0x11   : > { %vm310_vm1 = vcmp.eq.s32.totalorder %v306_v3, %v1517_v2  ;;  %v327_v16 = vpack.c.bf16 %v298_v11, %v298_v11  ;;  %v328_v17 = vpack.c.bf16 %v299_v12, %v299_v12  ;;  %v1559_v18 = vld [vmem:[%s1530_s30 + $0x70] sm:$0xff]  ;;  %v303_v19 = vld [vmem:[%s1530_s30 + $0x78] sm:$0xff]  ;;  %v344_v22 = vunpack.c.l.b16 %v319_v7  ;;  %v1579_v32 = vld [vmem:[%s1530_s30 + $0x28] sm:$0xff] }
  0x12   : > { %v1568_v21 = vsel %vm310_vm1, 1.0, %v1463_v13  ;;  %v345_v23 = vunpack.c.l.b16 %v320_v8  ;;  %v378_v24 = vunpack.c.l.b16 %v323_v10  ;;  %v331_v25 = vpack.c.bf16 %v1559_v18, %v1559_v18  ;;  %v1588_v41 = vld [vmem:[%s1530_s30 + $0x40] sm:$0xff]  ;;  %v1591_v42 = vld [vmem:[%s1530_s30 + $0x48] sm:$0xff] }
  0x13   : > { %v379_v28 = vunpack.c.l.b16 %v324_v15  ;;  %v408_v29 = vunpack.c.l.b16 %v327_v16  ;;  %v409_v30 = vunpack.c.l.b16 %v328_v17  ;;  %v332_v31 = vpack.c.bf16 %v303_v19, %v303_v19  ;;  %v1597_v47 = vld [vmem:[%s1530_s30 + $0x60] sm:$0xff]  ;;  %v1600_v48 = vld [vmem:[%s1530_s30 + $0x68] sm:$0xff] }
  0x14   : > { %v347_v33 = vpack.c.b16 %v345_v23, %v344_v22  ;;  %v438_v34 = vunpack.c.l.b16 %v331_v25  ;;  %v318_v36 = vpack.c.bf16 %v1573_v26, %v1573_v26  ;;  %v321_v40 = vpack.c.bf16 %v1576_v27, %v1576_v27 }
  0x15   : > { %v381_v37 = vpack.c.b16 %v379_v28, %v378_v24  ;;  %v411_v38 = vpack.c.b16 %v409_v30, %v408_v29  ;;  %v439_v39 = vunpack.c.l.b16 %v332_v31  ;;  %v342_v44 = vunpack.c.l.b16 %v317_v35 }
  0x16   : > { %v356_v43 = vsel %vm348_vm2, %v347_v33, 0  ;;  %v343_v45 = vunpack.c.l.b16 %v318_v36  ;;  %v322_v46 = vpack.c.bf16 %v1579_v32, %v1579_v32  ;;  %v376_v52 = vunpack.c.l.b16 %v321_v40 }
  0x17   : > { %364 = vmatpush.bf16.xpose.msra.mxu0 %v356_v43  ;;  %v386_v49 = vsel %vm348_vm2, %v381_v37, 0  ;;  %v416_v50 = vsel %vm348_vm2, %v411_v38, 0  ;;  %v441_v51 = vpack.c.b16 %v439_v39, %v438_v34  ;;  %v325_v55 = vpack.c.bf16 %v1588_v41, %v1588_v41 }
  0x18   : > { %394 = vmatpush.bf16.xpose.msra.mxu1 %v386_v49  ;;  %424 = vmatpush.bf16.xpose.msra.mxu2 %v416_v50  ;;  %v346_v53 = vpack.c.b16 %v343_v45, %v342_v44  ;;  %v377_v54 = vunpack.c.l.b16 %v322_v46  ;;  %v326_v56 = vpack.c.bf16 %v1591_v42, %v1591_v42  ;;  %v329_v58 = vpack.c.bf16 %v1597_v47, %v1597_v47 }
  0x19   : > { %v446_v57 = vsel %vm348_vm2, %v441_v51, 0  ;;  %v330_v59 = vpack.c.bf16 %v1600_v48, %v1600_v48  ;;  %v315_v60 = vpack.c.bf16 %v1554_v14, %v1554_v14  ;;  %v406_v62 = vunpack.c.l.b16 %v325_v55 }
  0x1a   : > { %454 = vmatpush.bf16.xpose.msra.mxu3 %v446_v57  ;;  %v380_v61 = vpack.c.b16 %v377_v54, %v376_v52  ;;  %v407_v63 = vunpack.c.l.b16 %v326_v56  ;;  %v316_v0 = vpack.c.bf16 %v1568_v21, %v1568_v21  ;;  %v436_v3 = vunpack.c.l.b16 %v329_v58  ;;  %v1429_v54 = vld [vmem:[%s1924_s3 + $0x18] sm:$0xff] }
  0x1b   : > { %v437_v7 = vunpack.c.l.b16 %v330_v59  ;;  %v353_v8 = vsel %vm348_vm2, %v346_v53, 0  ;;  %v335_v16 = vunpack.c.l.b16 %v315_v60  ;;  %vm996_vm15 = vcmask 15360  }
  0x1c   : > { %v410_v10 = vpack.c.b16 %v407_v63, %v406_v62  ;;  %v383_v11 = vsel %vm348_vm2, %v380_v61, 0  ;;  %v336_v17 = vunpack.c.l.b16 %v316_v0 }
  0x1d   : > { %v440_v12 = vpack.c.b16 %v437_v7, %v436_v3 }
  0x1e   : > { %v413_v15 = vsel %vm348_vm2, %v410_v10, 0  ;;  %v337_v22 = vpack.c.b16 %v336_v17, %v335_v16 }
  0x1f   : > { %365 = vmatpush.bf16.xpose.msra.mxu0 %v353_v8  ;;  %v443_v19 = vsel %vm348_vm2, %v440_v12, 0 }
  0x20   : > { %395 = vmatpush.bf16.xpose.msra.mxu1 %v383_v11  ;;  %425 = vmatpush.bf16.xpose.msra.mxu2 %v413_v15 }
  0x22   : > { %455 = vmatpush.bf16.xpose.msra.mxu3 %v443_v19 }
  0x26   : > { %1326 = vmatmul.msk.bf16.vlgmr.msra.gmra.mxu0 %vm348_vm2, %v337_v22 }
  0x27   : > { %1327 = vmatmul.msk.bf16.vlgmr.msra.gmra.mxu1 %vm348_vm2, %v337_v22  ;;  %1328 = vmatmul.msk.bf16.vlgmr.msra.gmra.mxu2 %vm348_vm2, %v337_v22 }
  0x29   : > { %1329 = vmatmul.msk.bf16.vlgmr.msra.gmra.mxu3 %vm348_vm2, %v337_v22 }
  0xa3   : > { %v367_v23 = vpop.f32.mrf.mxu0 }
  0xa4   : > { %v397_v24 = vpop.f32.mrf.mxu1  ;;  %v462_v28 = vpack.c.bf16 %v367_v23, %v367_v23 }
  0xa5   : > { %v464_v25 = vpack.c.bf16 %v397_v24, %v397_v24 }
  0xa6   : > { %v478_v37 = vunpack.c.l.b16 %v462_v28 }
  0xa7   : > { %v480_v35 = vunpack.c.l.b16 %v464_v25 }
  0xaa   : > { %v427_v29 = vpop.f32.mrf.mxu2 }
  0xab   : > { %v369_v30 = vpop.f32.mrf.mxu0  ;;  %v466_v39 = vpack.c.bf16 %v427_v29, %v427_v29 }
  0xac   : > { %v463_v31 = vpack.c.bf16 %v369_v30, %v369_v30  ;;  %v399_v33 = vpop.f32.mrf.mxu1  ;;  %v457_v34 = vpop.f32.mrf.mxu3 }
  0xad   : > { %v465_v36 = vpack.c.bf16 %v399_v33, %v399_v33  ;;  %v468_v45 = vpack.c.bf16 %v457_v34, %v457_v34  ;;  %v482_v50 = vunpack.c.l.b16 %v466_v39 }
  0xae   : > { %v479_v38 = vunpack.c.l.b16 %v463_v31 }
  0xaf   : > { %v481_v40 = vunpack.c.l.b16 %v465_v36  ;;  %v484_v59 = vunpack.c.l.b16 %v468_v45 }
  0xb0   : > { %v486_v43 = vpack.c.b16 %v479_v38, %v478_v37 }
  0xb1   : > { %v487_v44 = vpack.c.b16 %v481_v40, %v480_v35 }
  0xb2   : > { %v491_v46 = vshrl.u32 %v486_v43, 16  ;;  %v429_v49 = vpop.f32.mrf.mxu2  ;;  %537 = vrot.lane.b32.xlu0 %v486_v43, %s1464_s8  ;;  %v494_v56 = vshll.u32 %v486_v43, 16 }
  0xb3   : > { %v498_v51 = vshrl.u32 %v487_v44, 16  ;;  %v501_v52 = vshll.u32 %v487_v44, 16  ;;  %v467_v53 = vpack.c.bf16 %v429_v49, %v429_v49  ;;  %539 = vrot.lane.b32.xlu1 %v487_v44, %s1464_s8  ;;  %v1425_v49 = vld [vmem:[%s1922_s1 + $0x28] sm:$0xff] }
  0xb4   : > { %v493_v55 = vrot.slane %v491_v46, 7  ;;  %v459_v57 = vpop.f32.mrf.mxu3  ;;  %659 = vmatpush.bf16.msrb.mxu0 %v1425_v49 }
  0xb5   : > { %v500_v58 = vrot.slane %v498_v51, 7  ;;  %v483_v60 = vunpack.c.l.b16 %v467_v53  ;;  %v469_v61 = vpack.c.bf16 %v459_v57, %v459_v57  ;;  %v1423_v51 = vld [vmem:[%s1922_s1 + $0x18] sm:$0xff]  ;;  %v1421_v53 = vld [vmem:[%s1922_s1 + $0x8] sm:$0xff] }
  0xb6   : > { %v496_v62 = vor.u32 %v494_v56, %v493_v55  ;;  %v533_v63 = vsel %vm1627_vm5, %v493_v55, 0  ;;  %v1420_v55 = vld [vmem:[%s1922_s1] sm:$0xff] }
  0xb7   : > { %v488_v0 = vpack.c.b16 %v483_v60, %v482_v50  ;;  %v485_v3 = vunpack.c.l.b16 %v469_v61  ;;  %v503_v7 = vor.u32 %v501_v52, %v500_v58  ;;  %v534_v8 = vsel %vm1627_vm5, %v500_v58, 0  ;;  %v1424_v50 = vld [vmem:[%s1922_s1 + $0x20] sm:$0xff]  ;;  %v1422_v52 = vld [vmem:[%s1922_s1 + $0x10] sm:$0xff] }
  0xb8   : > { %v558_v10 = vrot.slane %v534_v8, 1  ;;  %v529_v11 = vsel %vm1627_vm5, 0, %v496_v62  ;;  %v555_v23 = vrot.slane %v533_v63, 1  ;;  %660 = vmatpush.bf16.msrb.mxu0 %v1424_v50 }
  0xb9   : > { %v505_v12 = vshrl.u32 %v488_v0, 16  ;;  %v508_v15 = vshll.u32 %v488_v0, 16  ;;  %v489_v16 = vpack.c.b16 %v485_v3, %v484_v59  ;;  %541 = vrot.lane.b32.xlu2 %v488_v0, %s1464_s8  ;;  %v530_v17 = vsel %vm1627_vm5, 0, %v503_v7 }
  0xba   : > { %v557_v19 = vrot.slane %v530_v17, 1  ;;  %v554_v22 = vrot.slane %v529_v11, 1 }
  0xbb   : > { %v507_v24 = vrot.slane %v505_v12, 7  ;;  %v512_v25 = vshrl.u32 %v489_v16, 16  ;;  %v515_v28 = vshll.u32 %v489_v16, 16 }
  0xbc   : > { %v559_v29 = vsel %vm553_vm6, %v557_v19, %v558_v10  ;;  %v556_v30 = vsel %vm553_vm6, %v554_v22, %v555_v23  ;;  %661 = vmatpush.bf16.msrb.mxu0 %v1423_v51 }
  0xbd   : > { %v514_v31 = vrot.slane %v512_v25, 7  ;;  %568 = vrot.lane.b32.xlu1 %v559_v29, %s1465_s9  ;;  %566 = vrot.lane.b32.xlu0 %v556_v30, %s1465_s9  ;;  %v510_v33 = vor.u32 %v508_v15, %v507_v24  ;;  %v535_v34 = vsel %vm1627_vm5, %v507_v24, 0 }
  0xbe   : > { %v561_v35 = vrot.slane %v535_v34, 1 }
  0xbf   : > { %v531_v36 = vsel %vm1627_vm5, 0, %v510_v33  ;;  %v517_v37 = vor.u32 %v515_v28, %v514_v31  ;;  %v536_v38 = vsel %vm1627_vm5, %v514_v31, 0 }
  0xc0   : > { %v560_v39 = vrot.slane %v531_v36, 1  ;;  %v564_v40 = vrot.slane %v536_v38, 1  ;;  %662 = vmatpush.bf16.msrb.mxu0 %v1422_v52 }
  0xc1   : > { %v532_v43 = vsel %vm1627_vm5, 0, %v517_v37 }
  0xc2   : > { %v562_v44 = vsel %vm553_vm6, %v560_v39, %v561_v35  ;;  %v563_v45 = vrot.slane %v532_v43, 1 }
  0xc3   : > { %570 = vrot.lane.b32.xlu2 %v562_v44, %s1465_s9 }
  0xc4   : > { %v565_v46 = vsel %vm553_vm6, %v563_v45, %v564_v40  ;;  %663 = vmatpush.bf16.msrb.mxu0 %v1421_v53 }
  0xc5   : > { %543 = vrot.lane.b32.xlu0 %v489_v16, %s1464_s8  ;;  %572 = vrot.lane.b32.xlu1 %v565_v46, %s1465_s9  ;;  %v1690_v16 = vld [vmem:[%s1923_s2] ss:$0 sm:$0xff] }
  0xc8   : > { %664 = vmatpush.bf16.msrb.mxu0 %v1420_v55 }
 0x113   : > { %v542_v0 = vpop.permute.xlu2 %541 }
 0x114   : > { %v583_v7 = vsel %vm574_vm7, %v531_v36, %v542_v0 }
 0x11d   : > { %v571_v3 = vpop.permute.xlu2 %570 }
 0x11e   : > { %v593_v8 = vsel %vm587_vm9, %v583_v7, %v571_v3 }
 0x124   : > { %v538_v56 = vpop.permute.xlu0 %537 }
 0x125   : > { %v577_v57 = vsel %vm574_vm7, %v529_v11, %v538_v56  ;;  %v540_v60 = vpop.permute.xlu1 %539 }
 0x126   : > { %v580_v62 = vsel %vm574_vm7, %v530_v17, %v540_v60 }
 0x12f   : > { %v567_v58 = vpop.permute.xlu0 %566  ;;  %v569_v61 = vpop.permute.xlu1 %568 }
 0x130   : > { %v589_v59 = vsel %vm587_vm9, %v577_v57, %v567_v58  ;;  %v591_v63 = vsel %vm587_vm9, %v580_v62, %v569_v61 }
 0x131   : > { %1354 = vmatmul.msk.bf16.vlgmr.msrb.gmra.mxu0 %vm648_vm8, %v589_v59 }
 0x137   : > { %v544_v10 = vpop.permute.xlu0 %543  ;;  %v573_v12 = vpop.permute.xlu1 %572 }
 0x138   : > { %v586_v11 = vsel %vm574_vm7, %v532_v43, %v544_v10 }
 0x139   : > { %v595_v15 = vsel %vm587_vm9, %v586_v11, %v573_v12 }
 0x141   : > { %1355 = vmatmul.msk.bf16.gmra.mxu0 %vm648_vm8, %v591_v63 }
 0x151   : > { %1356 = vmatmul.msk.bf16.gmra.mxu0 %vm648_vm8, %v593_v8 }
 0x161   : > { %1357 = vmatmul.msk.bf16.gmra.mxu0 %vm648_vm8, %v595_v15 }
 0x1ae   : > { %v666_v17 = vpop.f32.mrf.mxu0 }
 0x1af   : > { %v667_v19 = vadd.f32 %v1690_v16, %v666_v17 }
 0x1b1   : > { %v686_v22 = vmax.f32 %v667_v19, 0.0 }
 0x1b3   : > { %v694_v25 = vpack.c.bf16 %v686_v22, %v686_v22 }
 0x1b5   : > { %v710_v30 = vunpack.c.l.b16 %v694_v25 }
 0x1b6   : > { %v668_v23 = vpop.f32.mrf.mxu0 }
 0x1b7   : > { %v669_v24 = vadd.f32 %v1690_v16, %v668_v23 }
 0x1b9   : > { %v687_v28 = vmax.f32 %v669_v24, 0.0 }
 0x1bb   : > { %v695_v29 = vpack.c.bf16 %v687_v28, %v687_v28 }
 0x1bd   : > { %v711_v31 = vunpack.c.l.b16 %v695_v29 }
 0x1be   : > { %v671_v33 = vpop.f32.mrf.mxu0 }
 0x1bf   : > { %v718_v34 = vpack.c.b16 %v711_v31, %v710_v30  ;;  %v672_v35 = vadd.f32 %v1690_v16, %v671_v33 }
 0x1c1   : > { %766 = vrot.lane.b32.xlu2 %v718_v34, %s1464_s8  ;;  %v723_v36 = vshrl.u32 %v718_v34, 16  ;;  %v726_v37 = vshll.u32 %v718_v34, 16  ;;  %v688_v39 = vmax.f32 %v672_v35, 0.0 }
 0x1c3   : > { %v725_v38 = vrot.slane %v723_v36, 7  ;;  %v696_v51 = vpack.c.bf16 %v688_v39, %v688_v39 }
 0x1c5   : > { %v728_v40 = vor.u32 %v726_v37, %v725_v38  ;;  %v762_v43 = vsel %vm1627_vm5, %v725_v38, 0  ;;  %v712_v56 = vunpack.c.l.b16 %v696_v51 }
 0x1c6   : > { %v673_v44 = vpop.f32.mrf.mxu0  ;;  %v783_v50 = vrot.slane %v762_v43, 1 }
 0x1c7   : > { %v674_v45 = vadd.f32 %v1690_v16, %v673_v44  ;;  %v1701_v46 = vsel %vm1627_vm5, 0, %v728_v40 }
 0x1c8   : > { %v782_v49 = vrot.slane %v1701_v46, 1 }
 0x1c9   : > { %v689_v52 = vmax.f32 %v674_v45, 0.0 }
 0x1ca   : > { %v784_v53 = vsel %vm553_vm6, %v782_v49, %v783_v50 }
 0x1cb   : > { %v697_v55 = vpack.c.bf16 %v689_v52, %v689_v52  ;;  %794 = vrot.lane.b32.xlu0 %v784_v53, %s1465_s9 }
 0x1cd   : > { %v713_v57 = vunpack.c.l.b16 %v697_v55 }
 0x1ce   : > { %v676_v58 = vpop.f32.mrf.mxu0 }
 0x1cf   : > { %v719_v59 = vpack.c.b16 %v713_v57, %v712_v56  ;;  %v677_v60 = vadd.f32 %v1690_v16, %v676_v58 }
 0x1d1   : > { %768 = vrot.lane.b32.xlu1 %v719_v59, %s1464_s8  ;;  %v730_v61 = vshrl.u32 %v719_v59, 16  ;;  %v733_v62 = vshll.u32 %v719_v59, 16  ;;  %v690_v0 = vmax.f32 %v677_v60, 0.0 }
 0x1d3   : > { %v732_v63 = vrot.slane %v730_v61, 7  ;;  %v698_v17 = vpack.c.bf16 %v690_v0, %v690_v0  ;;  %v1431_v0 = vld [vmem:[%s1924_s3 + $0x28] sm:$0xff] }
 0x1d4   : > { %884 = vmatpush.bf16.msrb.mxu1 %v1431_v0 }
 0x1d5   : > { %v735_v3 = vor.u32 %v733_v62, %v732_v63  ;;  %v763_v7 = vsel %vm1627_vm5, %v732_v63, 0  ;;  %v714_v24 = vunpack.c.l.b16 %v698_v17 }
 0x1d6   : > { %v678_v8 = vpop.f32.mrf.mxu0  ;;  %v786_v15 = vrot.slane %v763_v7, 1  ;;  %v1428_v7 = vld [vmem:[%s1924_s3 + $0x10] sm:$0xff] }
 0x1d7   : > { %v679_v10 = vadd.f32 %v1690_v16, %v678_v8  ;;  %v1713_v11 = vsel %vm1627_vm5, 0, %v735_v3  ;;  %v1430_v3 = vld [vmem:[%s1924_s3 + $0x20] sm:$0xff]  ;;  %v1427_v8 = vld [vmem:[%s1924_s3 + $0x8] sm:$0xff] }
 0x1d8   : > { %v785_v12 = vrot.slane %v1713_v11, 1  ;;  %885 = vmatpush.bf16.msrb.mxu1 %v1430_v3  ;;  %v1466_v3 = vmov 16.0  }
 0x1d9   : > { %v691_v19 = vmax.f32 %v679_v10, 0.0  ;;  %v1426_v10 = vld [vmem:[%s1924_s3] sm:$0xff]  ;;  %1446 = vrcp.f32 %v1466_v3 }
 0x1da   : > { %v787_v22 = vsel %vm553_vm6, %v785_v12, %v786_v15 }
 0x1db   : > { %v699_v23 = vpack.c.bf16 %v691_v19, %v691_v19  ;;  %796 = vrot.lane.b32.xlu2 %v787_v22, %s1465_s9 }
 0x1dc   : > { %886 = vmatpush.bf16.msrb.mxu1 %v1429_v54 }
 0x1dd   : > { %v715_v25 = vunpack.c.l.b16 %v699_v23 }
 0x1de   : > { %v681_v28 = vpop.f32.mrf.mxu0 }
 0x1df   : > { %v720_v29 = vpack.c.b16 %v715_v25, %v714_v24  ;;  %v682_v30 = vadd.f32 %v1690_v16, %v681_v28 }
 0x1e0   : > { %887 = vmatpush.bf16.msrb.mxu1 %v1428_v7  ;;  %v995_v7 = vld [vmem:[%s1927_s6] sm:$0x3] }
 0x1e1   : > { %v737_v31 = vshrl.u32 %v720_v29, 16  ;;  %770 = vrot.lane.b32.xlu0 %v720_v29, %s1464_s8  ;;  %v740_v33 = vshll.u32 %v720_v29, 16  ;;  %v692_v35 = vmax.f32 %v682_v30, 0.0  ;;  %1387 = vmatpush.msk.msrb.mxu3 %vm1000_vm10, %v995_v7 }
 0x1e3   : > { %v739_v34 = vrot.slane %v737_v31, 7  ;;  %v700_v45 = vpack.c.bf16 %v692_v35, %v692_v35 }
 0x1e4   : > { %888 = vmatpush.bf16.msrb.mxu1 %v1427_v8 }
 0x1e5   : > { %v742_v36 = vor.u32 %v740_v33, %v739_v34  ;;  %v764_v37 = vsel %vm1627_vm5, %v739_v34, 0  ;;  %v716_v52 = vunpack.c.l.b16 %v700_v45 }
 0x1e6   : > { %v683_v38 = vpop.f32.mrf.mxu0  ;;  %v789_v44 = vrot.slane %v764_v37, 1 }
 0x1e7   : > { %v684_v39 = vadd.f32 %v1690_v16, %v683_v38  ;;  %v760_v40 = vsel %vm1627_vm5, 0, %v742_v36 }
 0x1e8   : > { %v788_v43 = vrot.slane %v760_v40, 1  ;;  %889 = vmatpush.bf16.msrb.mxu1 %v1426_v10 }
 0x1e9   : > { %v693_v49 = vmax.f32 %v684_v39, 0.0 }
 0x1ea   : > { %v790_v50 = vsel %vm553_vm6, %v788_v43, %v789_v44 }
 0x1eb   : > { %v701_v51 = vpack.c.bf16 %v693_v49, %v693_v49  ;;  %798 = vrot.lane.b32.xlu1 %v790_v50, %s1465_s9  ;;  %v961_v49 = vld [vmem:[%s1926_s5 + $0x18] sm:$0xff] }
 0x1ec   : > { %986 = vmatpush.msrb.mxu2 %v961_v49 }
 0x1ed   : > { %v717_v53 = vunpack.c.l.b16 %v701_v51 }
 0x1ef   : > { %v721_v55 = vpack.c.b16 %v717_v53, %v716_v52  ;;  %v960_v53 = vld [vmem:[%s1926_s5 + $0x10] sm:$0xff] }
 0x1f0   : > { %987 = vmatpush.msrb.mxu2 %v960_v53 }
 0x1f1   : > { %772 = vrot.lane.b32.xlu2 %v721_v55, %s1464_s8  ;;  %v744_v56 = vshrl.u32 %v721_v55, 16  ;;  %v747_v57 = vshll.u32 %v721_v55, 16 }
 0x1f3   : > { %v746_v16 = vrot.slane %v744_v56, 7  ;;  %v959_v56 = vld [vmem:[%s1926_s5 + $0x8] sm:$0xff] }
 0x1f4   : > { %988 = vmatpush.msrb.mxu2 %v959_v56 }
 0x1f5   : > { %v749_v58 = vor.u32 %v747_v57, %v746_v16  ;;  %v765_v59 = vsel %vm1627_vm5, %v746_v16, 0 }
 0x1f6   : > { %v792_v62 = vrot.slane %v765_v59, 1  ;;  %v958_v59 = vld [vmem:[%s1926_s5] sm:$0xff] }
 0x1f7   : > { %v761_v60 = vsel %vm1627_vm5, 0, %v749_v58  ;;  %989 = vmatpush.msrb.mxu2 %v958_v59 }
 0x1f8   : > { %v791_v61 = vrot.slane %v761_v60, 1 }
 0x1fa   : > { %v793_v63 = vsel %vm553_vm6, %v791_v61, %v792_v62 }
 0x1fb   : > { %800 = vrot.lane.b32.xlu0 %v793_v63, %s1465_s9 }
 0x21b   : > { %v767_v12 = vpop.permute.xlu2 %766 }
 0x21c   : > { %v804_v15 = vsel %vm574_vm7, %v1701_v46, %v767_v12 }
 0x235   : > { %v797_v24 = vpop.permute.xlu2 %796 }
 0x23d   : > { %v795_v17 = vpop.permute.xlu0 %794 }
 0x23e   : > { %v815_v19 = vsel %vm587_vm9, %v804_v15, %v795_v17  ;;  %v1447_v17 = vpop.eup %1446 }
 0x23f   : > { %1382 = vmatmul.msk.bf16.vlgmr.msrb.gmra.mxu1 %vm648_vm8, %v815_v19  ;;  %vm952_vm11 = vweird.f32 %v1447_v17 }
 0x243   : > { %v769_v22 = vpop.permute.xlu1 %768 }
 0x244   : > { %v807_v23 = vsel %vm574_vm7, %v1713_v11, %v769_v22 }
 0x245   : > { %v817_v25 = vsel %vm587_vm9, %v807_v23, %v797_v24  ;;  %v948_v24 = vmul.f32 16.0, %v1447_v17 }
 0x24b   : > { %v773_v31 = vpop.permute.xlu2 %772 }
 0x24c   : > { %v813_v33 = vsel %vm574_vm7, %v761_v60, %v773_v31  ;;  %v949_v31 = vsub.f32 1.0, %v948_v24 }
 0x24f   : > { %1383 = vmatmul.msk.bf16.gmra.mxu1 %vm648_vm8, %v817_v25 }
 0x253   : > { %v771_v28 = vpop.permute.xlu0 %770 }
 0x254   : > { %v810_v29 = vsel %vm574_vm7, %v760_v40, %v771_v28  ;;  %v1445_v40 = vld [vmem:[%s1925_s4] ss:$0 sm:$0xff] }
 0x25d   : > { %v799_v30 = vpop.permute.xlu1 %798 }
 0x25e   : > { %v819_v46 = vsel %vm587_vm9, %v810_v29, %v799_v30 }
 0x25f   : > { %1384 = vmatmul.msk.bf16.gmra.mxu1 %vm648_vm8, %v819_v46 }
 0x26d   : > { %v801_v34 = vpop.permute.xlu0 %800 }
 0x26e   : > { %v821_v35 = vsel %vm587_vm9, %v813_v33, %v801_v34 }
 0x26f   : > { %1385 = vmatmul.msk.bf16.gmra.mxu1 %vm648_vm8, %v821_v35 }
 0x2bc   : > { %v891_v11 = vpop.f32.mrf.mxu1 }
 0x2bd   : > { %v1778_v50 = vadd.f32 %v1445_v40, %v891_v11 }
 0x2bf   : > { %v911_v61 = vsel %vm574_vm7, %v1778_v50, 0.0 }
 0x2c4   : > { %v893_v36 = vpop.f32.mrf.mxu1 }
 0x2c5   : > { %v1771_v44 = vadd.f32 %v1445_v40, %v893_v36 }
 0x2c7   : > { %v912_v57 = vsel %vm574_vm7, %v1771_v44, 0.0 }
 0x2c8   : > { %v913_v0 = vadd.f32 %v912_v57, %v911_v61 }
 0x2ca   : > { %v914_v12 = vrot.slane %v913_v0, 4 }
 0x2cc   : > { %v896_v37 = vpop.f32.mrf.mxu1  ;;  %v915_v23 = vadd.f32 %v914_v12, %v913_v0 }
 0x2cd   : > { %v1773_v45 = vadd.f32 %v1445_v40, %v896_v37 }
 0x2ce   : > { %v916_v30 = vrot.slane %v915_v23, 2 }
 0x2cf   : > { %v920_v16 = vsel %vm574_vm7, %v1773_v45, 0.0 }
 0x2d0   : > { %v917_v37 = vadd.f32 %v916_v30, %v915_v23 }
 0x2d4   : > { %v898_v38 = vpop.f32.mrf.mxu1 }
 0x2d5   : > { %v1769_v43 = vadd.f32 %v1445_v40, %v898_v38 }
 0x2d7   : > { %v921_v51 = vsel %vm574_vm7, %v1769_v43, 0.0 }
 0x2d8   : > { %v922_v60 = vadd.f32 %v921_v51, %v920_v16 }
 0x2da   : > { %v923_v8 = vrot.slane %v922_v60, 4 }
 0x2dc   : > { %v901_v39 = vpop.f32.mrf.mxu1  ;;  %v924_v19 = vadd.f32 %v923_v8, %v922_v60 }
 0x2dd   : > { %v1782_v52 = vadd.f32 %v1445_v40, %v901_v39  ;;  %v950_v39 = vmul.f32 %v1447_v17, %v949_v31 }
 0x2de   : > { %v925_v25 = vrot.slane %v924_v19, 2 }
 0x2df   : > { %v929_v62 = vsel %vm574_vm7, %v1782_v52, 0.0  ;;  %v951_v57 = vadd.f32 %v1447_v17, %v950_v39 }
 0x2e0   : > { %v926_v34 = vadd.f32 %v925_v25, %v924_v19 }
 0x2e2   : > { %v927_v49 = vrot.slane %v926_v34, 1 }
 0x2e4   : > { %v903_v55 = vpop.f32.mrf.mxu1 }
 0x2e5   : > { %v1794_v58 = vadd.f32 %v1445_v40, %v903_v55  ;;  %v918_v55 = vrot.slane %v917_v37, 1 }
 0x2e7   : > { %v930_v63 = vsel %vm574_vm7, %v1794_v58, 0.0  ;;  %v919_v60 = vadd.f32 %v918_v55, %v917_v37 }
 0x2e8   : > { %v931_v54 = vadd.f32 %v930_v63, %v929_v62  ;;  %v953_v62 = vsel %vm952_vm11, %v1447_v17, %v951_v57 }
 0x2ea   : > { %v932_v10 = vrot.slane %v931_v54, 4 }
 0x2ec   : > { %v906_v15 = vpop.f32.mrf.mxu1  ;;  %v933_v22 = vadd.f32 %v932_v10, %v931_v54  ;;  %v954_v54 = vmul.f32 %v953_v62, %v919_v60 }
 0x2ed   : > { %v1808_v29 = vadd.f32 %v1445_v40, %v906_v15 }
 0x2ee   : > { %v934_v28 = vrot.slane %v933_v22, 2 }
 0x2ef   : > { %v938_v11 = vsel %vm574_vm7, %v1808_v29, 0.0 }
 0x2f0   : > { %v935_v35 = vadd.f32 %v934_v28, %v933_v22 }
 0x2f2   : > { %v936_v53 = vrot.slane %v935_v35, 1 }
 0x2f4   : > { %v908_v46 = vpop.f32.mrf.mxu1  ;;  %v937_v59 = vadd.f32 %v936_v53, %v935_v35 }
 0x2f5   : > { %v1810_v33 = vadd.f32 %v1445_v40, %v908_v46  ;;  %v928_v40 = vadd.f32 %v927_v49, %v926_v34 }
 0x2f6   : > { %v956_v3 = vmul.f32 %v953_v62, %v937_v59 }
 0x2f7   : > { %v939_v36 = vsel %vm574_vm7, %v1810_v33, 0.0  ;;  %v955_v63 = vmul.f32 %v953_v62, %v928_v40 }
 0x2f8   : > { %v940_v38 = vadd.f32 %v939_v36, %v938_v11 }
 0x2f9   : > { %v967_v10 = vsel %vm966_vm12, %v955_v63, %v954_v54 }
 0x2fa   : > { %v941_v51 = vrot.slane %v940_v38, 4  ;;  %v969_v12 = vsel %vm968_vm13, %v956_v3, %v967_v10 }
 0x2fc   : > { %v942_v56 = vadd.f32 %v941_v51, %v940_v38 }
 0x2fe   : > { %v943_v16 = vrot.slane %v942_v56, 2 }
 0x300   : > { %v944_v61 = vadd.f32 %v943_v16, %v942_v56 }
 0x302   : > { %v945_v0 = vrot.slane %v944_v61, 1 }
 0x304   : > { %v946_v7 = vadd.f32 %v945_v0, %v944_v61 }
 0x306   : > { %v957_v8 = vmul.f32 %v953_v62, %v946_v7 }
 0x308   : > { %v971_v15 = vsel %vm970_vm14, %v957_v8, %v969_v12 }
 0x309   : > { %1386 = vmatmul.msk.f32.vlgmr.msrb.gmra.mxu2 %vm574_vm7, %v971_v15 }
 0x38c   : > { %v991_v19 = vpop.f32.mrf.mxu2 }
 0x38d   : > { %v994_v22 = vmax.f32 %v991_v19, 0.0 }
 0x38f   : > { %1388 = vmatmul.msk.f32.vlgmr.msrb.gmra.mxu3 %vm996_vm15, %v994_v22 }
 0x412   : > { %v1021_v23 = vpop.f32.mrf.mxu3 }
 0x413   : > { %v1389_v17 = vmul.f32 -1.442695, %v1021_v23 }
 0x415   : > { %1448 = vpow2.f32 %v1389_v17 }
 0x41b   : > { %v1449_v24 = vpop.eup %1448 }
 0x41c   : > { %v1027_v25 = vadd.f32 1.0, %v1449_v24 }
 0x41e   : > { %1450 = vrcp.f32 %v1027_v25  ;;  %v1039_v31 = vand.u32 2147483648, %v1027_v25  ;;  %v1037_v35 = vand.u32 2147483647, %v1027_v25  ;;  %vm1033_vm1 = vweird.f32 %v1027_v25 }
 0x420   : > { %v1040_v36 = vor.u32 1.1754944e-38, %v1039_v31  ;;  %vm1038_vm4 = vcmp.eq.f32.partialorder %v1037_v35, 8.507059e+37  ;;  %v1452_v35 = vld [vmem:[%s1530_s30 + $0x50] sm:$0xff] }
 0x424   : > { %v1451_v28 = vpop.eup %1450 }
 0x425   : > { %v1029_v30 = vmul.f32 %v1451_v28, %v1027_v25  ;;  %vm1034_vm0 = vweird.f32 %v1451_v28 }
 0x426   : > { %vm1035_vm3 = vmor %vm1033_vm1, %vm1034_vm0 }
 0x427   : > { %v1030_v46 = vsub.f32 1.0, %v1029_v30 }
 0x429   : > { %v1031_v34 = vmul.f32 %v1451_v28, %v1030_v46 }
 0x42b   : > { %v1032_v11 = vadd.f32 %v1451_v28, %v1031_v34 }
 0x42d   : > { %v1036_v37 = vsel %vm1035_vm3, %v1451_v28, %v1032_v11 }
 0x42e   : > { %v1041_v38 = vsel %vm1038_vm4, %v1040_v36, %v1036_v37 }
 0x42f   : > { %v1047_v39 = vperm.slane %v1041_v38, 0  ;;  %v1044_v49 = vrot.slane %v1041_v38, 1  ;;  %v1045_v51 = vrot.slane %v1041_v38, 2  ;;  %v1046_v53 = vrot.slane %v1041_v38, 3 }
 0x431   : > { %v1056_v55 = vmul.f32 %v1047_v39, %v1771_v44  ;;  %v1048_v56 = vperm.slane %v1044_v49, 0  ;;  %v1049_v57 = vperm.slane %v1045_v51, 0  ;;  %v1050_v16 = vperm.slane %v1046_v53, 0 }
 0x432   : > { %v1055_v59 = vmul.f32 %v1047_v39, %v1778_v50  ;;  %v1063_v50 = vadd.s32 16, %v1515_v1  ;;  %v1453_v39 = vld [vmem:[%s1530_s30 + $0x58] sm:$0xff] }
 0x433   : > { %1392 = vmatpush.xpose.msk.msra.mxu2 %vm574_vm7, %v1056_v55  ;;  %v1058_v40 = vmul.f32 %v1048_v56, %v1769_v43  ;;  %v1060_v60 = vmul.f32 %v1049_v57, %v1794_v58  ;;  %v1057_v61 = vmul.f32 %v1048_v56, %v1773_v45  ;;  %v1062_v44 = vmul.f32 %v1050_v16, %v1810_v33  ;;  %v1454_v55 = vld [vmem:[%s1530_s30 + $0x78] sm:$0xff] }
 0x434   : > { %v1059_v43 = vmul.f32 %v1049_v57, %v1782_v52  ;;  %v1061_v45 = vmul.f32 %v1050_v16, %v1808_v29  ;;  %vm1065_vm5 = vcmp.eq.s32.totalorder %v1063_v50, %v1517_v2  ;;  %v1064_v58 = vadd.s32 24, %v1515_v1 }
 0x435   : > { %1398 = vmatpush.xpose.msk.msra.mxu3 %vm574_vm7, %v1058_v40  ;;  %v1390_v52 = vsel %vm1065_vm5, 1.0, %v1463_v13 }
 0x436   : > { %vm1066_vm6 = vcmp.eq.s32.totalorder %v1064_v58, %v1517_v2 }
 0x437   : > { %1393 = vmatpush.xpose.msk.msra.mxu2 %vm574_vm7, %v1055_v59  ;;  %v1391_v29 = vsel %vm1066_vm6, 1.0, %v1463_v13 }
 0x439   : > { %1399 = vmatpush.xpose.msk.msra.mxu3 %vm574_vm7, %v1057_v61 }
 0x43a   : > { %1394 = vmatmul.msk.f32.vlgmr.msra.gmra.mxu2 %vm574_vm7, %v1554_v14 }
 0x43b   : > { %1404 = vmatpush.xpose.msk.msrb.mxu2 %vm574_vm7, %v1060_v60 }
 0x43c   : > { %1400 = vmatmul.msk.f32.vlgmr.msra.gmra.mxu3 %vm574_vm7, %v1554_v14 }
 0x43d   : > { %1410 = vmatpush.xpose.msk.msrb.mxu3 %vm574_vm7, %v1062_v44 }
 0x43f   : > { %1405 = vmatpush.xpose.msk.msrb.mxu2 %vm574_vm7, %v1059_v43 }
 0x441   : > { %1411 = vmatpush.xpose.msk.msrb.mxu3 %vm574_vm7, %v1061_v45 }
 0x442   : > { %1395 = vmatmul.msk.f32.gmra.mxu2 %vm574_vm7, %v1568_v21 }
 0x444   : > { %1401 = vmatmul.msk.f32.gmra.mxu3 %vm574_vm7, %v1568_v21 }
 0x44a   : > { %1396 = vmatmul.msk.f32.gmra.mxu2 %vm574_vm7, %v1390_v52 }
 0x44c   : > { %1402 = vmatmul.msk.f32.gmra.mxu3 %vm574_vm7, %v1390_v52 }
 0x452   : > { %1397 = vmatmul.msk.f32.gmra.mxu2 %vm574_vm7, %v1391_v29 }
 0x454   : > { %1403 = vmatmul.msk.f32.gmra.mxu3 %vm574_vm7, %v1391_v29 }
 0x45a   : > { %1406 = vmatmul.msk.f32.vlgmr.msrb.gmra.mxu2 %vm574_vm7, %v1554_v14 }
 0x45c   : > { %1412 = vmatmul.msk.f32.vlgmr.msrb.gmra.mxu3 %vm574_vm7, %v1554_v14 }
 0x462   : > { %1407 = vmatmul.msk.f32.gmra.mxu2 %vm574_vm7, %v1568_v21 }
 0x464   : > { %1413 = vmatmul.msk.f32.gmra.mxu3 %vm574_vm7, %v1568_v21 }
 0x46a   : > { %1408 = vmatmul.msk.f32.gmra.mxu2 %vm574_vm7, %v1390_v52 }
 0x46c   : > { %1414 = vmatmul.msk.f32.gmra.mxu3 %vm574_vm7, %v1390_v52 }
 0x472   : > { %1409 = vmatmul.msk.f32.gmra.mxu2 %vm574_vm7, %v1391_v29 }
 0x474   : > { %1415 = vmatmul.msk.f32.gmra.mxu3 %vm574_vm7, %v1391_v29 }
 0x4bd   : > { %v1106_v1 = vpop.f32.mrf.mxu2 }
 0x4be   : > { %v1107_v2 = vadd.f32 %v1106_v1, %v1563_v20 }
 0x4bf   : > { %v1141_v13 = vpop.f32.mrf.mxu3 }
 0x4c0   : > { %v1223_v14 = vmax.f32 %v1107_v2, 0.0  ;;  %v1142_v21 = vadd.f32 %v1141_v13, %v1576_v27 }
 0x4c2   : > { %1239 = vst.msk [vmem:[%s1869_s13] sm:$0xff] %vm348_vm2, %v1223_v14  ;;  %v1227_v33 = vmax.f32 %v1142_v21, 0.0 }
 0x4c4   : > { %1243 = vst.msk [vmem:[%s1869_s13 + $0x20] sm:$0xff] %vm348_vm2, %v1227_v33 }
 0x4c5   : > { %v1109_v20 = vpop.f32.mrf.mxu2 }
 0x4c6   : > { %v1110_v62 = vadd.f32 %v1109_v20, %v1573_v26 }
 0x4c7   : > { %v1144_v63 = vpop.f32.mrf.mxu3 }
 0x4c8   : > { %v1224_v0 = vmax.f32 %v1110_v62, 0.0  ;;  %v1145_v3 = vadd.f32 %v1144_v63, %v1579_v32 }
 0x4ca   : > { %1240 = vst.msk [vmem:[%s1869_s13 + $0x8] sm:$0xff] %vm348_vm2, %v1224_v0  ;;  %v1228_v54 = vmax.f32 %v1145_v3, 0.0 }
 0x4cc   : > { %1244 = vst.msk [vmem:[%s1869_s13 + $0x28] sm:$0xff] %vm348_vm2, %v1228_v54 }
 0x4cd   : > { %v1112_v27 = vpop.f32.mrf.mxu2 }
 0x4ce   : > { %v1113_v7 = vadd.f32 %v1112_v27, %v1534_v4 }
 0x4cf   : > { %v1147_v8 = vpop.f32.mrf.mxu3 }
 0x4d0   : > { %v1225_v10 = vmax.f32 %v1113_v7, 0.0  ;;  %v1148_v12 = vadd.f32 %v1147_v8, %v1540_v6 }
 0x4d2   : > { %1241 = vst.msk [vmem:[%s1869_s13 + $0x10] sm:$0xff] %vm348_vm2, %v1225_v10  ;;  %v1229_v26 = vmax.f32 %v1148_v12, 0.0 }
 0x4d4   : > { %1245 = vst.msk [vmem:[%s1869_s13 + $0x30] sm:$0xff] %vm348_vm2, %v1229_v26 }
 0x4d5   : > { %v1115_v32 = vpop.f32.mrf.mxu2 }
 0x4d6   : > { %v1116_v15 = vadd.f32 %v1115_v32, %v1537_v5 }
 0x4d7   : > { %v1150_v19 = vpop.f32.mrf.mxu3 }
 0x4d8   : > { %v1226_v22 = vmax.f32 %v1116_v15, 0.0  ;;  %v1151_v23 = vadd.f32 %v1150_v19, %v1547_v9 }
 0x4da   : > { %1242 = vst.msk [vmem:[%s1869_s13 + $0x18] sm:$0xff] %vm348_vm2, %v1226_v22  ;;  %v1230_v4 = vmax.f32 %v1151_v23, 0.0 }
 0x4dc   : > { %1246 = vst.msk [vmem:[%s1869_s13 + $0x38] sm:$0xff] %vm348_vm2, %v1230_v4 }
 0x4dd   : > { %v1176_v6 = vpop.f32.mrf.mxu2 }
 0x4de   : > { %v1177_v17 = vadd.f32 %v1176_v6, %v1588_v41 }
 0x4df   : > { %v1211_v24 = vpop.f32.mrf.mxu3 }
 0x4e0   : > { %v1231_v25 = vmax.f32 %v1177_v17, 0.0  ;;  %v1212_v28 = vadd.f32 %v1211_v24, %v1597_v47 }
 0x4e2   : > { %1247 = vst.msk [vmem:[%s1869_s13 + $0x40] sm:$0xff] %vm348_vm2, %v1231_v25  ;;  %v1235_v5 = vmax.f32 %v1212_v28, 0.0 }
 0x4e4   : > { %1251 = vst.msk [vmem:[%s1869_s13 + $0x60] sm:$0xff] %vm348_vm2, %v1235_v5 }
 0x4e5   : > { %v1179_v9 = vpop.f32.mrf.mxu2 }
 0x4e6   : > { %v1180_v30 = vadd.f32 %v1179_v9, %v1591_v42 }
 0x4e7   : > { %v1214_v46 = vpop.f32.mrf.mxu3 }
 0x4e8   : > { %v1232_v31 = vmax.f32 %v1180_v30, 0.0  ;;  %v1215_v41 = vadd.f32 %v1214_v46, %v1600_v48 }
 0x4ea   : > { %1248 = vst.msk [vmem:[%s1869_s13 + $0x48] sm:$0xff] %vm348_vm2, %v1232_v31  ;;  %v1236_v34 = vmax.f32 %v1215_v41, 0.0 }
 0x4ec   : > { %1252 = vst.msk [vmem:[%s1869_s13 + $0x68] sm:$0xff] %vm348_vm2, %v1236_v34 }
 0x4ed   : > { %v1182_v47 = vpop.f32.mrf.mxu2 }
 0x4ee   : > { %v1183_v11 = vadd.f32 %v1452_v35, %v1182_v47 }
 0x4ef   : > { %v1217_v36 = vpop.f32.mrf.mxu3 }
 0x4f0   : > { %v1233_v37 = vmax.f32 %v1183_v11, 0.0  ;;  %v1218_v42 = vadd.f32 %v1217_v36, %v1559_v18 }
 0x4f2   : > { %1249 = vst.msk [vmem:[%s1869_s13 + $0x50] sm:$0xff] %vm348_vm2, %v1233_v37  ;;  %v1237_v38 = vmax.f32 %v1218_v42, 0.0 }
 0x4f4   : > { %1253 = vst.msk [vmem:[%s1869_s13 + $0x70] sm:$0xff] %vm348_vm2, %v1237_v38 }
 0x4f5   : > { %v1185_v48 = vpop.f32.mrf.mxu2 }
 0x4f6   : > { %v1186_v49 = vadd.f32 %v1453_v39, %v1185_v48 }
 0x4f7   : > { %v1220_v51 = vpop.f32.mrf.mxu3 }
 0x4f8   : > { %v1234_v53 = vmax.f32 %v1186_v49, 0.0  ;;  %v1221_v56 = vadd.f32 %v1454_v55, %v1220_v51 }
 0x4fa   : > { %1250 = vst.msk [vmem:[%s1869_s13 + $0x58] sm:$0xff] %vm348_vm2, %v1234_v53  ;;  %v1238_v57 = vmax.f32 %v1221_v56, 0.0 }
 0x4fc   : > { %1254 = vst.msk [vmem:[%s1869_s13 + $0x78] sm:$0xff] %vm348_vm2, %v1238_v57 }
 0x4fd PF: > { %s17_s24 = sadd.s32 1, %s1461_s24  }
 0x4fe   : > { %p14_p4 = scmp.ge.s32.totalorder %s17_s24, 4  }
 0x500   :  { %16 = sbr.rel (!%p14_p4) target bundleno = 1 (0x1), region = 78 }

</bundles_post_ra>
